<compile_context>
chip_gen: v5e
topology: v5e:2x2
jax: 0.10.0
libtpu: 0.0.40
codegen_flags: <defaults>
</compile_context>

<pallas_src>
import functools

import jax
import jax.numpy as jnp
from jax.experimental import pallas as pl
from jax.experimental.pallas import tpu as pltpu

EPS = 1e-5


def adain_kernel(x_ref, gb_ref, o_ref):
    # x_ref : (rows_block, HW)    gb_ref : (rows_block, 2) = [1+gamma, beta]
    x = x_ref[...].astype(jnp.float32)
    gb = gb_ref[...].astype(jnp.float32)
    g = gb[:, 0:1]                      # (rows_block, 1) = 1 + gamma
    bt = gb[:, 1:2]                     # (rows_block, 1) = beta

    mean = jnp.mean(x, axis=-1, keepdims=True)
    centered = x - mean
    var = jnp.mean(centered * centered, axis=-1, keepdims=True)   # biased (InstanceNorm)
    inv_std = jax.lax.rsqrt(var + EPS)

    scale = g * inv_std                 # (rows_block, 1)
    shift = bt - mean * scale           # (rows_block, 1)
    o_ref[...] = (x * scale + shift).astype(o_ref.dtype)


@functools.partial(jax.jit, static_argnames=("target_block_bytes",))
def adain(x, s, w, b, *, target_block_bytes: int = 4 << 20):
    """x: (N, C, H, W), s: (N, S), w: (S, 2C), b: (2C,)  ->  (N, C, H, W)."""
    N, C, H, W = x.shape
    HW = H * W
    total_rows = N * C
    itemsize = jnp.dtype(x.dtype).itemsize

    # ---- fc hoisted out of the kernel (one XLA matmul for the whole batch) ----
    h = (s.astype(jnp.float32) @ w.astype(jnp.float32)) + b.astype(jnp.float32)
    gamma = h[:, :C].reshape(total_rows)
    beta = h[:, C:].reshape(total_rows)
    gb = jnp.stack([1.0 + gamma, beta], axis=-1)      # (N*C, 2) f32

    # ---- layout: (N*C, HW) rows (free reshape, no copy, no padding) ----
    x_rows = x.reshape(total_rows, HW)

    # ---- block sizing -------------------------------------------------------
    sub = {4: 8, 2: 16, 1: 32}.get(itemsize, 8)       # sublane multiple per dtype
    lanes = 128
    hw_vmem = -(-HW // lanes) * lanes                 # lane-padded VMEM width

    # Per-row VMEM footprint of one grid step:
    #   x block (2 buffers) + out block (2 buffers)
    #   + ~3 f32 full-block temporaries (x_f32, centered, result)
    #   + gb block (2-wide, lane-padded to 128, 2 buffers)
    per_row_vmem = (2 * hw_vmem * itemsize
                    + 2 * hw_vmem * itemsize
                    + 3 * hw_vmem * 4
                    + 2 * lanes * 4)
    slack = 1 << 20

    try:
        vmem_cap = int(pltpu.get_tpu_info().vmem_capacity_bytes)
    except Exception:
        vmem_cap = 64 << 20                           # conservative (v7x)
    vmem_budget = int(0.70 * vmem_cap)

    rows_target = max(sub, target_block_bytes // max(1, HW * itemsize))
    rows_vmem = max(sub, (vmem_budget - slack) // per_row_vmem)
    rows_block = int(min(rows_target, rows_vmem, total_rows))
    if total_rows >= 2 * sub:                         # >=2 grid steps for v7x's 2 TCs
        rows_block = min(rows_block, -(-total_rows // 2))
    if rows_block < total_rows:
        rows_block = max(sub, (rows_block // sub) * sub)
    # (rows_block == total_rows is legal regardless of divisibility: full-dim block.)

    grid = (pl.cdiv(total_rows, rows_block),)         # ragged final block handled by Pallas
    vmem_need = rows_block * per_row_vmem + slack
    vmem_limit = int(min(max(vmem_need, 16 << 20), int(0.9 * vmem_cap)))

    out_rows = pl.pallas_call(
        adain_kernel,
        out_shape=jax.ShapeDtypeStruct((total_rows, HW), x.dtype),
        grid_spec=pltpu.PrefetchScalarGridSpec(
            num_scalar_prefetch=0,
            grid=grid,
            in_specs=[
                pl.BlockSpec((rows_block, HW), lambda i: (i, 0)),
                pl.BlockSpec((rows_block, 2), lambda i: (i, 0)),
            ],
            out_specs=pl.BlockSpec((rows_block, HW), lambda i: (i, 0)),
        ),
        compiler_params=pltpu.CompilerParams(
            dimension_semantics=("parallel",),
            vmem_limit_bytes=vmem_limit,
        ),
    )(x_rows, gb)

    return out_rows.reshape(N, C, H, W)


def adain_ref(x, s, w, b):
    """Pure-JAX reference matching PyTorch AdaIN semantics."""
    N, C, H, W = x.shape
    h = s @ w + b                                      # (N, 2C)
    gamma = h[:, :C].reshape(N, C, 1, 1)
    beta = h[:, C:].reshape(N, C, 1, 1)
    mean = jnp.mean(x, axis=(2, 3), keepdims=True)
    var = jnp.mean((x - mean) ** 2, axis=(2, 3), keepdims=True)   # biased
    x_norm = (x - mean) / jnp.sqrt(var + EPS)
    return (1 + gamma) * x_norm + beta


if __name__ == "__main__":
    # Small shapes consistent with the module.
    N, C, H, W = 2, 4, 16, 16
    style_dim = 32

    key = jax.random.PRNGKey(0)
    kx, ks, kw, kb = jax.random.split(key, 4)

    x = jax.random.normal(kx, (N, C, H, W), dtype=jnp.float32)
    s = jax.random.normal(ks, (N, style_dim), dtype=jnp.float32)

    # nn.Linear(style_dim, 2*C) params, stored as (in, out) so h = s @ w + b.
    bound = 1.0 / (style_dim ** 0.5)
    w = jax.random.uniform(kw, (style_dim, 2 * C), dtype=jnp.float32,
                           minval=-bound, maxval=bound)
    b = jax.random.uniform(kb, (2 * C,), dtype=jnp.float32,
                           minval=-bound, maxval=bound)

    out = adain(x, s, w, b)
    jax.block_until_ready(out)

    ref = adain_ref(x, s, w, b)
    assert jnp.allclose(out, ref, atol=1e-4, rtol=1e-4), (
        float(jnp.max(jnp.abs(out - ref)))
    )
    print("KERNEL_OK")
</pallas_src>

<mosaic_0001>
module attributes {stable_mosaic.version = 11 : i64} {
  func.func @adain_kernel(%arg0: i32, %arg1: memref<8x256xf32, #tpu.memory_space<vmem>>, %arg2: memref<8x2xf32, #tpu.memory_space<vmem>>, %arg3: memref<8x256xf32, #tpu.memory_space<vmem>>) attributes {dimension_semantics = [#tpu.dimension_semantics<parallel>], iteration_bounds = array<i64: 1>, scalar_prefetch = 0 : i64, scratch_operands = 0 : i64, tpu.core_type = #tpu.core_type<tc>, window_params = [{transform_indices = @transform_0, window_bounds = array<i64: 8, 256>}, {transform_indices = @transform_1, window_bounds = array<i64: 8, 2>}, {transform_indices = @transform_2, window_bounds = array<i64: 8, 256>}]} {
    %c0 = arith.constant 0 : index
    %c0_0 = arith.constant 0 : index
    %0 = vector.load %arg1[%c0, %c0_0] : memref<8x256xf32, #tpu.memory_space<vmem>>, vector<8x256xf32>
    %c0_1 = arith.constant 0 : index
    %c0_2 = arith.constant 0 : index
    %1 = vector.load %arg2[%c0_1, %c0_2] : memref<8x2xf32, #tpu.memory_space<vmem>>, vector<8x2xf32>
    %2 = vector.extract_strided_slice %1 {offsets = [0, 0], sizes = [8, 1], strides = [1, 1]} : vector<8x2xf32> to vector<8x1xf32>
    %3 = vector.extract_strided_slice %1 {offsets = [0, 1], sizes = [8, 1], strides = [1, 1]} : vector<8x2xf32> to vector<8x1xf32>
    %cst = arith.constant dense<0.000000e+00> : vector<8xf32>
    %4 = vector.multi_reduction <add>, %0, %cst [1] : vector<8x256xf32> to vector<8xf32>
    %5 = vector.shape_cast %4 : vector<8xf32> to vector<8x1xf32>
    %cst_3 = arith.constant 2.560000e+02 : f32
    %6 = vector.broadcast %cst_3 : f32 to vector<8x1xf32>
    %7 = arith.divf %5, %6 : vector<8x1xf32>
    %8 = vector.broadcast %7 : vector<8x1xf32> to vector<8x256xf32>
    %9 = arith.subf %0, %8 : vector<8x256xf32>
    %10 = arith.mulf %9, %9 : vector<8x256xf32>
    %cst_4 = arith.constant dense<0.000000e+00> : vector<8xf32>
    %11 = vector.multi_reduction <add>, %10, %cst_4 [1] : vector<8x256xf32> to vector<8xf32>
    %12 = vector.shape_cast %11 : vector<8xf32> to vector<8x1xf32>
    %cst_5 = arith.constant 2.560000e+02 : f32
    %13 = vector.broadcast %cst_5 : f32 to vector<8x1xf32>
    %14 = arith.divf %12, %13 : vector<8x1xf32>
    %cst_6 = arith.constant 9.99999974E-6 : f32
    %15 = vector.broadcast %cst_6 : f32 to vector<8x1xf32>
    %16 = arith.addf %14, %15 : vector<8x1xf32>
    %17 = math.rsqrt %16 : vector<8x1xf32>
    %18 = arith.mulf %2, %17 : vector<8x1xf32>
    %19 = arith.mulf %7, %18 : vector<8x1xf32>
    %20 = arith.subf %3, %19 : vector<8x1xf32>
    %21 = vector.broadcast %18 : vector<8x1xf32> to vector<8x256xf32>
    %22 = arith.mulf %0, %21 : vector<8x256xf32>
    %23 = vector.broadcast %20 : vector<8x1xf32> to vector<8x256xf32>
    %24 = arith.addf %22, %23 : vector<8x256xf32>
    %c0_7 = arith.constant 0 : index
    %c0_8 = arith.constant 0 : index
    %25 = vector.load %arg3[%c0_7, %c0_8] : memref<8x256xf32, #tpu.memory_space<vmem>>, vector<8x256xf32>
    tpu.vector_store %arg3[%c0_7, %c0_8], %24 {strides = array<i32>} : memref<8x256xf32, #tpu.memory_space<vmem>>, vector<8x256xf32>,
    return
  }
  func.func @transform_0(%arg0: i32) -> (i32, i32) {
    %c0_i32 = arith.constant 0 : i32
    %c0_i32_0 = arith.constant 0 : i32
    return %arg0, %c0_i32 : i32, i32
  }
  func.func @transform_1(%arg0: i32) -> (i32, i32) {
    %c0_i32 = arith.constant 0 : i32
    %c0_i32_0 = arith.constant 0 : i32
    return %arg0, %c0_i32 : i32, i32
  }
  func.func @transform_2(%arg0: i32) -> (i32, i32) {
    %c0_i32 = arith.constant 0 : i32
    %c0_i32_0 = arith.constant 0 : i32
    return %arg0, %c0_i32 : i32, i32
  }
}

</mosaic_0001>

<bundles_post_ra>
// kernel: adain.1
= control target key start
LH: loop header
LB: loop body
LE: loop exit
PB: predicated region body
PF: predicated region fallthrough
CT: control target
= control target key end

     0   :  { %v82_v3 = vmov 256.0   ;;  %v83_v17 = vmov 0   ;;  %s84_s14 = smov 1   ;;  %v85_v31 = vmov 1   ;;  %s116_s0 = inlined_call_operand.vmem [shape: f32[8,256], index: 0, kind: input, shape index: {}]   ;;  %s117_s1 = inlined_call_operand.vmem [shape: f32[8,2], index: 1, kind: input, shape index: {}]   ;;  %s118_s2 = inlined_call_operand.vmem [shape: f32[8,256], index: 2, kind: output, shape index: {}]  }
   0x1   :  { %v11_v0 = vld [vmem:[%s116_s0] sm:$0xff]  ;;  %v12_v1 = vld [vmem:[%s116_s0 + $0x8] sm:$0xff]  ;;  %78 = vrcp.f32 %v82_v3  ;;  %75 = vset.pattern.permute.xlu1 %v83_v17  ;;  %76 = vset.pattern.permute.xlu2 %v85_v31 }
   0x2   :  { %v14_v2 = vadd.f32 %v12_v1, %v11_v0  ;;  %v13_v26 = vld [vmem:[%s117_s1] sm:$0xff]  ;;  %77 = vset.pattern.permute.xlu0 %v85_v31 }
   0x4   :  { %15 = vadd.xlane.f32.xlu0 %v14_v2 }
   0x7   :  { %v79_v4 = vpop.eup %78 }
   0x8   :  { %v18_v5 = vmul.f32 256.0, %v79_v4  ;;  %vm22_vm0 = vweird.f32 %v79_v4 }
   0xa   :  { %v19_v6 = vsub.f32 1.0, %v18_v5 }
   0xc   :  { %v20_v7 = vmul.f32 %v79_v4, %v19_v6 }
   0xe   :  { %v21_v8 = vadd.f32 %v79_v4, %v20_v7 }
  0x10   :  { %v23_v9 = vsel %vm22_vm0, %v79_v4, %v21_v8 }
  0x77   :  { %v16_v10 = vpop.xlane.xlu0 %15 }
  0x78   :  { %v24_v11 = vmul.f32 %v23_v9, %v16_v10 }
  0x7a   :  { %v25_v12 = vsub.f32 %v11_v0, %v24_v11  ;;  %v26_v13 = vsub.f32 %v12_v1, %v24_v11 }
  0x7c   :  { %v27_v14 = vmul.f32 %v25_v12, %v25_v12  ;;  %v28_v15 = vmul.f32 %v26_v13, %v26_v13 }
  0x7e   :  { %v29_v16 = vadd.f32 %v28_v15, %v27_v14 }
  0x80   :  { %30 = vadd.xlane.f32.xlu0 %v29_v16 }
  0xf3   :  { %v31_v18 = vpop.xlane.xlu0 %30 }
  0xf4   :  { %v32_v19 = vmul.f32 %v31_v18, %v23_v9 }
  0xf6   :  { %v33_v20 = vadd.f32 1e-05, %v32_v19 }
  0xf8   :  { %80 = vrsqrt.f32 %v33_v20  ;;  %vm40_vm2 = vweird.f32 %v33_v20 }
  0xfe   :  { %v81_v21 = vpop.eup %80 }
  0xff   :  { %v35_v22 = vmul.f32 %v81_v21, %v33_v20  ;;  %vm41_vm1 = vweird.f32 %v81_v21 }
 0x100   :  { %vm42_vm3 = vmor %vm40_vm2, %vm41_vm1 }
 0x101   :  { %v36_v23 = vmul.f32 %v81_v21, %v35_v22 }
 0x103   :  { %v37_v24 = vmul.f32 0.5, %v36_v23 }
 0x105   :  { %v38_v25 = vsub.f32 1.5, %v37_v24 }
 0x107   :  { %v39_v27 = vmul.f32 %v81_v21, %v38_v25 }
 0x109   :  { %v43_v28 = vsel %vm42_vm3, %v81_v21, %v39_v27 }
 0x10a   :  { %v44_v29 = vmul.f32 %v43_v28, %v13_v26 }
 0x10c   :  { %v45_v30 = vmul.f32 %v44_v29, %v24_v11 }
 0x10e   :  { %47 = vrot.lane.b32.xlu1 %v45_v30, %s84_s14 }
 0x116   :  { %53 = vperm.xlu1 %75, %v44_v29  }
 0x180   :  { %v48_v32 = vpop.permute.xlu1 %47 }
 0x181   :  { %v50_v33 = vsub.f32 %v13_v26, %v48_v32 }
 0x183   :  { %60 = vperm.xlu2 %76, %v50_v33  }
 0x188   :  { %v54_v34 = vpop.permute.xlu1 %53 }
 0x189   :  { %v56_v35 = vmul.f32 %v54_v34, %v11_v0  ;;  %v57_v36 = vmul.f32 %v54_v34, %v12_v1 }
 0x1dd   :  { %v61_v37 = vpop.permute.xlu2 %60 }
 0x1de   :  { %v63_v38 = vadd.f32 %v61_v37, %v56_v35  ;;  %v64_v39 = vadd.f32 %v61_v37, %v57_v36 }
 0x1e0   :  { %65 = vst [vmem:[%s118_s2] sm:$0xff] %v63_v38 }
 0x1e1   :  { %66 = vst [vmem:[%s118_s2 + $0x8] sm:$0xff] %v64_v39 }

</bundles_post_ra>
